<compile_context>
chip_gen: v5e
topology: v5e:2x2
jax: 0.10.0
libtpu: 0.0.40
codegen_flags: <defaults>
</compile_context>

<pallas_src>
import numpy as np
import jax
import jax.numpy as jnp
from jax.experimental import pallas as pl
from jax.experimental.pallas import tpu as pltpu

# ---------------- small, module-consistent shapes ----------------
B, S = 2, 8              # batch, sequence length
L = 8                    # n_landmarks (== `channels` arg of MyEncoder)
NC = 2                   # n_coords
DIM = 32                 # encoder dimension (out_dim of FeatureExtractor)
LOUT = (L + 2 - 3) // 2 + 1        # conv output width (stride 2, pad 1, k 3) = 4
IN_CH = (32 // 2) * L              # stem_linear in_features = LOUT * 32 = 128
KWIN = 3 * (L + 2) * NC            # per-output-row conv window length = 60
KPAD = 64                          # sublane-aligned contraction dim (60 -> 64)
EPS = 1e-5

# Static selector: SEL[kw, wpos, l] = 1 iff wpos == 2*l + kw (stride-2 width).
_sel = np.zeros((3, L + 2, LOUT), np.float32)
for _kw in range(3):
    for _l in range(LOUT):
        _sel[_kw, 2 * _l + _kw, _l] = 1.0
SEL = jnp.asarray(_sel)


# ------------- fused kernel: conv + BN2d + SiLU + linear + BN1d + mask -------------
def fe_fused_kernel(xwin_ref, wbig_ref, bias_ref, wlin_ref, m_ref, o_ref):
    bias = bias_ref[...]                                # (2, 128) f32, packed biases
    # Conv expressed as a matmul; BN2d scale pre-folded into wbig.  The result
    # is already in the torch "permute+reshape" layout (M, LOUT*32) = (M, 128).
    h = jnp.dot(xwin_ref[...], wbig_ref[...],
                preferred_element_type=jnp.float32)     # bf16 x bf16 -> f32
    h = h + bias[0:1, :]                                # folded BN2d bias
    # SiLU: sigmoid(h) == 0.5*(tanh(0.5*h)+1) -> a single EUP op per element.
    h = h * (0.5 * jnp.tanh(0.5 * h) + 0.5)
    # stem_linear; BN1d scale pre-folded into wlin.
    y = jnp.dot(h.astype(jnp.bfloat16), wlin_ref[...],
                preferred_element_type=jnp.float32)     # bf16 x bf16 -> f32
    y = y + bias[1:2, :DIM]                             # folded BN1d bias
    # masked_fill(~mask, 0) as a broadcast multiply with the 0/1 mask column.
    o_ref[...] = y * m_ref[...]


def feature_extractor_fused(x_win, w_big, bias_pack, w_lin, mask_col, *, tile_m=512):
    M = x_win.shape[0]
    out_shape = jax.ShapeDtypeStruct((M, DIM), jnp.float32)

    if M <= tile_m or M % tile_m != 0:
        # Small-M (toy) path: whole-array VMEM refs, no grid -> no pipeline
        # machinery; fixed launch cost is the entire runtime here.
        vmem = pl.BlockSpec(memory_space=pltpu.MemorySpace.VMEM)
        return pl.pallas_call(
            fe_fused_kernel,
            out_shape=out_shape,
            in_specs=[vmem, vmem, vmem, vmem, vmem],
            out_specs=vmem,
        )(x_win, w_big, bias_pack, w_lin, mask_col)

    # Production-M path: stream rows in large tiles; weights/biases stay
    # VMEM-resident (constant index_map); "parallel" shards M across v7x's
    # two TensorCores (no-op on v5e/v6e).
    return pl.pallas_call(
        fe_fused_kernel,
        out_shape=out_shape,
        grid=(M // tile_m,),
        in_specs=[
            pl.BlockSpec((tile_m, KPAD), lambda i: (i, 0)),
            pl.BlockSpec((KPAD, IN_CH), lambda i: (0, 0)),
            pl.BlockSpec((2, IN_CH), lambda i: (0, 0)),
            pl.BlockSpec((IN_CH, DIM), lambda i: (0, 0)),
            pl.BlockSpec((tile_m, 1), lambda i: (i, 0)),
        ],
        out_specs=pl.BlockSpec((tile_m, DIM), lambda i: (i, 0)),
        compiler_params=pltpu.CompilerParams(
            dimension_semantics=("parallel",)),
    )(x_win, w_big, bias_pack, w_lin, mask_col)


# ---------------- trace-level glue (fused by XLA into one tiny op) ----------------
def build_xwin(data):
    # data: (B, S, L, NC) channels-last.  For output row (b, s) the conv needs
    # padded height rows s..s+2, i.e. a flat window of 3*(L+2)*NC = 60 values;
    # column index = kh*(L+2)*NC + wpos*NC + c.
    xp = jnp.pad(data, ((0, 0), (1, 1), (1, 1), (0, 0)))        # (B, S+2, L+2, NC)
    xr = xp.reshape(B, S + 2, (L + 2) * NC)                     # (B, 10, 20)
    win = jnp.concatenate(
        [xr[:, 0:S], xr[:, 1:S + 1], xr[:, 2:S + 2]], axis=-1)  # (B, S, 60)
    win = win.reshape(B * S, KWIN)                              # (16, 60)
    return jnp.pad(win, ((0, 0), (0, KPAD - KWIN)))             # (16, 64)


def build_wbig(conv_w, s2):
    # conv_w: (3, 3, NC, 32) HWIO; s2: folded BN2d scale (32,).
    # W_big[kh*(L+2)*NC + wpos*NC + c, l*32 + oc] = s2[oc]*W[kh, wpos-2l, c, oc]
    # when 0 <= wpos - 2l <= 2, else 0  (stride-2 width handled by SEL).
    w = conv_w * s2[None, None, None, :]
    wb = jnp.einsum('kwl,hkco->hwclo', SEL, w)                  # (3, 10, 2, 4, 32)
    wb = wb.reshape(KWIN, IN_CH)                                # (60, 128)
    return jnp.pad(wb, ((0, KPAD - KWIN), (0, 0)))              # (64, 128)


# ---------------- parameters + forward ----------------
def init_params(key):
    ks = jax.random.split(key, 10)
    p = {}
    # conv_stem.weight (HWIO layout: 3,3,NC,32), no bias
    p["conv_w"] = 0.1 * jax.random.normal(ks[0], (3, 3, NC, 32), jnp.float32)
    # bn_conv (BatchNorm2d over 32 channels) + SiLU
    p["bn2_gamma"] = 1.0 + 0.1 * jax.random.normal(ks[1], (32,), jnp.float32)
    p["bn2_beta"] = 0.1 * jax.random.normal(ks[2], (32,), jnp.float32)
    p["bn2_mean"] = 0.1 * jax.random.normal(ks[3], (32,), jnp.float32)
    p["bn2_var"] = jnp.abs(1.0 + 0.1 * jax.random.normal(ks[4], (32,), jnp.float32))
    # stem_linear.weight (stored transposed: in_features x out_dim), no bias
    p["lin_w"] = 0.05 * jax.random.normal(ks[5], (IN_CH, DIM), jnp.float32)
    # stem_bn (BatchNorm1d over DIM features)
    p["bn1_gamma"] = 1.0 + 0.1 * jax.random.normal(ks[6], (DIM,), jnp.float32)
    p["bn1_beta"] = 0.1 * jax.random.normal(ks[7], (DIM,), jnp.float32)
    p["bn1_mean"] = 0.1 * jax.random.normal(ks[8], (DIM,), jnp.float32)
    p["bn1_var"] = jnp.abs(1.0 + 0.1 * jax.random.normal(ks[9], (DIM,), jnp.float32))
    return p


def my_encoder_forward(data, mask, p):
    # Fold BatchNorms (eval running stats) into weights/biases -- trace-level.
    s2 = p["bn2_gamma"] * jax.lax.rsqrt(p["bn2_var"] + EPS)
    b2 = p["bn2_beta"] - p["bn2_mean"] * s2
    s1 = p["bn1_gamma"] * jax.lax.rsqrt(p["bn1_var"] + EPS)
    b1 = p["bn1_beta"] - p["bn1_mean"] * s1

    # bf16 matmul operands (halve DMA bytes, native MXU rate); biases stay f32.
    w_big = build_wbig(p["conv_w"], s2).astype(jnp.bfloat16)     # (64, 128)
    w_lin = (p["lin_w"] * s1[None, :]).astype(jnp.bfloat16)      # (128, 32)
    bias_pack = jnp.stack(                                       # (2, 128) f32
        [jnp.tile(b2, LOUT), jnp.pad(b1, (0, IN_CH - DIM))], axis=0)

    x_win = build_xwin(data).astype(jnp.bfloat16)                # (16, 64)
    mask_col = mask.reshape(B * S, 1).astype(jnp.float32)        # (16, 1)

    y = feature_extractor_fused(x_win, w_big, bias_pack, w_lin, mask_col)
    x = y.reshape(B, S, DIM)

    # TODO(synk): SqueezeformerBlock stack (num_layers) omitted -- not defined
    #             in the reference source.
    feats = x
    return x, feats


if __name__ == "__main__":
    key = jax.random.PRNGKey(0)
    k_data, k_param = jax.random.split(key)
    data = jax.random.normal(k_data, (B, S, L, NC), jnp.float32)   # batch['input']
    # batch['input_mask']: last 3 positions of sample 1 are padding (1 = valid)
    mask = jnp.ones((B, S), jnp.int32).at[1, S - 3:].set(0)

    params = init_params(k_param)
    fwd = jax.jit(my_encoder_forward)
    out, feats = fwd(data, mask, params)
    jax.block_until_ready((out, feats))

    assert out.shape == (B, S, DIM) and feats.shape == (B, S, DIM)
    assert bool(jnp.all(out[1, S - 3:] == 0.0))   # masked rows exactly zero
    assert bool(jnp.all(jnp.isfinite(out)))
    print("KERNEL_OK")
</pallas_src>

<mosaic_0001>
module attributes {stable_mosaic.version = 11 : i64} {
  func.func @fe_fused_kernel(%arg0: memref<16x64xbf16, #tpu.memory_space<vmem>>, %arg1: memref<64x128xbf16, #tpu.memory_space<vmem>>, %arg2: memref<2x128xf32, #tpu.memory_space<vmem>>, %arg3: memref<128x32xbf16, #tpu.memory_space<vmem>>, %arg4: memref<16x1xf32, #tpu.memory_space<vmem>>, %arg5: memref<16x32xf32, #tpu.memory_space<vmem>>) attributes {dimension_semantics = [], scalar_prefetch = 0 : i64, scratch_operands = 0 : i64, tpu.core_type = #tpu.core_type<tc>} {
    %c0 = arith.constant 0 : index
    %c0_0 = arith.constant 0 : index
    %0 = vector.load %arg2[%c0, %c0_0] : memref<2x128xf32, #tpu.memory_space<vmem>>, vector<2x128xf32>
    %c0_1 = arith.constant 0 : index
    %c0_2 = arith.constant 0 : index
    %1 = vector.load %arg0[%c0_1, %c0_2] : memref<16x64xbf16, #tpu.memory_space<vmem>>, vector<16x64xbf16>
    %c0_3 = arith.constant 0 : index
    %c0_4 = arith.constant 0 : index
    %2 = vector.load %arg1[%c0_3, %c0_4] : memref<64x128xbf16, #tpu.memory_space<vmem>>, vector<64x128xbf16>
    %cst = arith.constant dense<0.000000e+00> : vector<16x128xf32>
    %3 = tpu.matmul %1, %2, %cst {dimension_numbers = #tpu.dot_dimension_numbers<[1], [0], [0], [1], [0, 0, 1, 1], [], []>} : vector<16x64xbf16>, vector<64x128xbf16>, vector<16x128xf32> -> vector<16x128xf32>
    %4 = vector.extract_strided_slice %0 {offsets = [0, 0], sizes = [1, 128], strides = [1, 1]} : vector<2x128xf32> to vector<1x128xf32>
    %5 = vector.broadcast %4 : vector<1x128xf32> to vector<16x128xf32>
    %6 = arith.addf %3, %5 : vector<16x128xf32>
    %cst_5 = arith.constant 5.000000e-01 : f32
    %7 = vector.broadcast %cst_5 : f32 to vector<16x128xf32>
    %8 = arith.mulf %7, %6 : vector<16x128xf32>
    %9 = math.tanh %8 : vector<16x128xf32>
    %cst_6 = arith.constant 5.000000e-01 : f32
    %10 = vector.broadcast %cst_6 : f32 to vector<16x128xf32>
    %11 = arith.mulf %10, %9 : vector<16x128xf32>
    %cst_7 = arith.constant 5.000000e-01 : f32
    %12 = vector.broadcast %cst_7 : f32 to vector<16x128xf32>
    %13 = arith.addf %11, %12 : vector<16x128xf32>
    %14 = arith.mulf %6, %13 : vector<16x128xf32>
    %15 = arith.truncf %14 : vector<16x128xf32> to vector<16x128xbf16>
    %c0_8 = arith.constant 0 : index
    %c0_9 = arith.constant 0 : index
    %16 = vector.load %arg3[%c0_8, %c0_9] : memref<128x32xbf16, #tpu.memory_space<vmem>>, vector<128x32xbf16>
    %cst_10 = arith.constant dense<0.000000e+00> : vector<16x32xf32>
    %17 = tpu.matmul %15, %16, %cst_10 {dimension_numbers = #tpu.dot_dimension_numbers<[1], [0], [0], [1], [0, 0, 1, 1], [], []>} : vector<16x128xbf16>, vector<128x32xbf16>, vector<16x32xf32> -> vector<16x32xf32>
    %18 = vector.extract_strided_slice %0 {offsets = [1, 0], sizes = [1, 32], strides = [1, 1]} : vector<2x128xf32> to vector<1x32xf32>
    %19 = vector.broadcast %18 : vector<1x32xf32> to vector<16x32xf32>
    %20 = arith.addf %17, %19 : vector<16x32xf32>
    %c0_11 = arith.constant 0 : index
    %c0_12 = arith.constant 0 : index
    %21 = vector.load %arg4[%c0_11, %c0_12] : memref<16x1xf32, #tpu.memory_space<vmem>>, vector<16x1xf32>
    %22 = vector.broadcast %21 : vector<16x1xf32> to vector<16x32xf32>
    %23 = arith.mulf %20, %22 : vector<16x32xf32>
    %c0_13 = arith.constant 0 : index
    %c0_14 = arith.constant 0 : index
    %24 = vector.load %arg5[%c0_13, %c0_14] : memref<16x32xf32, #tpu.memory_space<vmem>>, vector<16x32xf32>
    tpu.vector_store %arg5[%c0_13, %c0_14], %23 {strides = array<i32>} : memref<16x32xf32, #tpu.memory_space<vmem>>, vector<16x32xf32>,
    return
  }
}

</mosaic_0001>

<bundles_post_ra>
// kernel: tile.8
= control target key start
LH: loop header
LB: loop body
LE: loop exit
PB: predicated region body
PF: predicated region fallthrough
CT: control target
= control target key end

     0   :  { %s22_s0 = inlined_call_operand.vmem [shape: f32[32], index: 0, kind: input, shape index: {}]   ;;  %s23_s1 = inlined_call_operand.vmem [shape: f32[4,32], index: 1, kind: output, shape index: {}]  }
   0x1   :  { %v4_v0 = vld [vmem:[%s22_s0] ss:$0 sm:$0xff] }
   0x2   :  { %5 = vst [vmem:[%s23_s1] sm:$0xf] %v4_v0 }

// kernel: tile.9
= control target key start
LH: loop header
LB: loop body
LE: loop exit
PB: predicated region body
PF: predicated region fallthrough
CT: control target
= control target key end

     0   :  { %s37_s8 = smov 32   ;;  %s38_s9 = smov 64   ;;  %vm7_vm0 = vcmask 261120   ;;  %vm13_vm1 = vcmask 1048320   ;;  %vm19_vm2 = vcmask 785920   ;;  %vm25_vm3 = vcmask 523520   ;;  %s55_s0 = inlined_call_operand.vmem [shape: f32[4,32], index: 0, kind: input, shape index: {}]   ;;  %s56_s1 = inlined_call_operand.vmem [shape: f32[1,128], index: 1, kind: output, shape index: {}]  }
   0x1   :  { %v4_v0 = vld [vmem:[%s55_s0] sm:$0xf]  ;;  %s36_s0 = smov 96  }
   0x2   :  { %5 = vst [vmem:[#allocation1] sm:$0xf] %v4_v0 }
   0x9   :  { %v10_v1 = vld [vmem:[#allocation1 + $0x3] sm:$0x1]   ;;  %v22_v2 = vld [vmem:[#allocation1 + $0x1] sm:$0x1]   ;;  %v16_v3 = vld [vmem:[#allocation1 + $0x2] sm:$0x1]  }
   0xa   :  { %11 = vrot.lane.b32.xlu0 %v10_v1, %s36_s0  ;;  %23 = vrot.lane.b32.xlu1 %v22_v2, %s37_s8  ;;  %v6_v4 = vld [vmem:[#allocation1] sm:$0x1]  }
   0xb   :  { %8 = vst.msk [vmem:[#allocation0] sm:$0x1] %vm7_vm0, %v6_v4  }
  0x12   :  { %17 = vrot.lane.b32.xlu0 %v16_v3, %s38_s9 }
  0x7c   :  { %v12_v5 = vpop.permute.xlu0 %11   ;;  %v24_v6 = vpop.permute.xlu1 %23  }
  0x7d   :  { %14 = vst.msk [vmem:[#allocation0] sm:$0x1] %vm13_vm1, %v12_v5  }
  0x84   :  { %v18_v7 = vpop.permute.xlu0 %17  }
  0x85   :  { %20 = vst.msk [vmem:[#allocation0] sm:$0x1] %vm19_vm2, %v18_v7  }
  0x86   :  { %26 = vst.msk [vmem:[#allocation0] sm:$0x1] %vm25_vm3, %v24_v6  }
  0x8d   :  { %v29_v8 = vld [vmem:[#allocation0] sm:$0x1] }
  0x8e   :  { %32 = vst [vmem:[%s56_s1] sm:$0x1] %v29_v8 }

// kernel: my_encoder_forward.1
= control target key start
LH: loop header
LB: loop body
LE: loop exit
PB: predicated region body
PF: predicated region fallthrough
CT: control target
= control target key end

     0   :  { %vm62_vm0 = vcmask 523264   ;;  %v263_v16 = vmov 0   ;;  %vm184_vm1 = vcmask 261120   ;;  %s348_s1 = inlined_call_operand.vmem [shape: bf16[64,128], index: 1, kind: input, shape index: {}]   ;;  %s349_s3 = inlined_call_operand.vmem [shape: bf16[128,32], index: 3, kind: input, shape index: {}]   ;;  %s350_s0 = inlined_call_operand.vmem [shape: bf16[16,64], index: 0, kind: input, shape index: {}]   ;;  %s351_s2 = inlined_call_operand.vmem [shape: f32[2,128], index: 2, kind: input, shape index: {}]   ;;  %s352_s4 = inlined_call_operand.vmem [shape: f32[16,1], index: 4, kind: input, shape index: {}]   ;;  %s353_s5 = inlined_call_operand.vmem [shape: f32[16,32], index: 5, kind: output, shape index: {}]  }
   0x1   :  { %v248_v0 = vld [vmem:[%s348_s1 + $0x18] sm:$0xff]  ;;  %v247_v2 = vld [vmem:[%s348_s1 + $0x10] sm:$0xff]  ;;  %v246_v3 = vld [vmem:[%s348_s1 + $0x8] sm:$0xff]  ;;  %258 = vset.pattern.permute.xlu0 %v263_v16 }
   0x2   :  { %v256_v1 = vld [vmem:[%s349_s3 + $0x38] sm:$0xff]  ;;  %70 = vmatpush.bf16.msra.mxu0 %v248_v0  ;;  %v245_v4 = vld [vmem:[%s348_s1] sm:$0xff]  ;;  %v255_v6 = vld [vmem:[%s349_s3 + $0x30] sm:$0xff] }
   0x3   :  { %156 = vmatpush.bf16.msra.mxu1 %v256_v1  ;;  %v244_v5 = vld [vmem:[%s350_s0] sm:$0xff]  ;;  %v254_v7 = vld [vmem:[%s349_s3 + $0x28] sm:$0xff]  ;;  %v252_v9 = vld [vmem:[%s349_s3 + $0x18] sm:$0xff] }
   0x4   :  { %v253_v8 = vld [vmem:[%s349_s3 + $0x20] sm:$0xff]  ;;  %v251_v10 = vld [vmem:[%s349_s3 + $0x10] sm:$0xff]  ;;  %v250_v11 = vld [vmem:[%s349_s3 + $0x8] sm:$0xff] }
   0x5   :  { %v249_v12 = vld [vmem:[%s349_s3] sm:$0xff]  ;;  %v171_v20 = vld [vmem:[%s352_s4 + $0x8] sm:$0xff] }
   0x6   :  { %71 = vmatpush.bf16.msra.mxu0 %v247_v2  ;;  %v21_v13 = vld [vmem:[%s351_s2] sm:$0x3] }
   0x7   :  { %157 = vmatpush.bf16.msra.mxu1 %v255_v6  ;;  %v170_v14 = vld [vmem:[%s352_s4] sm:$0xff]  ;;  %v32_v15 = vperm.slane %v21_v13, 0  ;;  %v107_v33 = vperm.slane %v21_v13, 1 }
   0x8   :  { %174 = vperm.xlu0 %258, %v170_v14  }
   0xa   :  { %72 = vmatpush.bf16.msra.mxu0 %v246_v3 }
   0xb   :  { %158 = vmatpush.bf16.msra.mxu1 %v254_v7 }
   0xe   :  { %73 = vmatpush.bf16.msra.mxu0 %v245_v4 }
   0xf   :  { %159 = vmatpush.bf16.msra.mxu1 %v253_v8 }
  0x10   :  { %179 = vperm.xlu0 %258, %v171_v20  }
  0x11   :  { %211 = vmatmul.msk.bf16.vlgmr.msra.gmra.mxu0 %vm62_vm0, %v244_v5 }
  0x13   :  { %160 = vmatpush.bf16.msra.mxu1 %v252_v9 }
  0x17   :  { %161 = vmatpush.bf16.msra.mxu1 %v251_v10 }
  0x1b   :  { %162 = vmatpush.bf16.msra.mxu1 %v250_v11 }
  0x1f   :  { %163 = vmatpush.bf16.msra.mxu1 %v249_v12 }
  0x7a   :  { %v175_v34 = vpop.permute.xlu0 %174 }
  0x82   :  { %v180_v40 = vpop.permute.xlu0 %179 }
  0x8e   :  { %v75_v17 = vpop.f32.mrf.mxu0 }
  0x8f   :  { %v76_v18 = vadd.f32 %v75_v17, %v32_v15 }
  0x91   :  { %v80_v19 = vmul.f32 0.5, %v76_v18 }
  0x93   :  { %259 = vtanh.f32 %v80_v19 }
  0x96   :  { %v77_v21 = vpop.f32.mrf.mxu0 }
  0x97   :  { %v78_v22 = vadd.f32 %v77_v21, %v32_v15 }
  0x99   :  { %v81_v23 = vmul.f32 0.5, %v78_v22  ;;  %v260_v24 = vpop.eup %259 }
  0x9a   :  { %v84_v25 = vmul.f32 0.5, %v260_v24 }
  0x9b   :  { %261 = vtanh.f32 %v81_v23 }
  0x9c   :  { %v86_v27 = vadd.f32 0.5, %v84_v25 }
  0x9e   :  { %v88_v30 = vmul.f32 %v86_v27, %v76_v18 }
  0xa1   :  { %v262_v26 = vpop.eup %261 }
  0xa2   :  { %v85_v28 = vmul.f32 0.5, %v262_v26 }
  0xa4   :  { %v87_v29 = vadd.f32 0.5, %v85_v28 }
  0xa6   :  { %v89_v31 = vmul.f32 %v87_v29, %v78_v22 }
  0xa8   :  { %v90_v32 = vpack.c.bf16 %v89_v31, %v88_v30 }
  0xaa   :  { %164 = vmatmul.bf16.vlgmr.msra.gmra.mxu1 %v90_v32 }
 0x127   :  { %v165_v35 = vpop.f32.mrf.mxu1 }
 0x128   :  { %v166_v36 = vadd.f32 %v165_v35, %v107_v33 }
 0x12a   :  { %v182_v37 = vmul.f32 %v175_v34, %v166_v36 }
 0x12c   :  { %185 = vst.msk [vmem:[%s353_s5] sm:$0xff] %vm184_vm1, %v182_v37 }
 0x12f   :  { %v167_v38 = vpop.f32.mrf.mxu1 }
 0x130   :  { %v168_v39 = vadd.f32 %v167_v38, %v107_v33 }
 0x132   :  { %v183_v41 = vmul.f32 %v180_v40, %v168_v39 }
 0x134   :  { %186 = vst.msk [vmem:[%s353_s5 + $0x8] sm:$0xff] %vm184_vm1, %v183_v41 }

</bundles_post_ra>
